<compile_context>
chip_gen: v5e
topology: v5e:2x2
jax: 0.10.0
libtpu: 0.0.40
codegen_flags: <defaults>
</compile_context>

<pallas_src>
import math

import jax
import jax.numpy as jnp
from jax.experimental import pallas as pl
from jax.experimental.pallas import tpu as pltpu


# ----------------------------------------------------------------------------
# Fused PriorCNN kernel: one grid step == one group of batch elements packed
# along the lane axis.
#   x_ref    : (1, W)            zero-padded, batch-packed input slab
#   mask_ref : (1, W)            1.0 on interior columns, 0.0 on halos/tail
#   w0_ref   : (K, F, 1)         first conv weights, tap-major
#   b0_ref   : (F, 1)            first conv bias
#   wr_ref   : (L, F, K*F)       remaining conv weights (BN folded), im2col-packed
#   br_ref   : (L, F, 1)         remaining conv biases (BN folded)
#   o_ref    : (F, W)            output slab (lane-dense store)
# ----------------------------------------------------------------------------
def _prior_cnn_kernel(x_ref, mask_ref, w0_ref, b0_ref, wr_ref, br_ref, o_ref):
    f, w = o_ref.shape
    ksize = w0_ref.shape[0]
    pad = ksize // 2
    n_rest = wr_ref.shape[0]  # (conv_depth - 2) middle layers + final conv

    mask = mask_ref[...]      # (1, w)
    x = x_ref[...]            # (1, w), halos already zero from the wrapper

    def shifted(a, t):        # a[:, j + t - pad] via a circular lane roll (XLU)
        return a if t == pad else pltpu.roll(a, shift=(pad - t) % w, axis=1)

    # ---- layer 0: Conv1d(1 -> F). Pure VPU broadcast-FMAs, acc seeded by bias.
    h = jnp.broadcast_to(b0_ref[...], (f, w))
    for t in range(ksize):
        h = h + w0_ref[t] * shifted(x, t)          # (F,1) * (1,w) -> (F,w)
    h = h * mask                                   # re-zero halo separators

    # ---- F->F layers: one fused (F, K*F) @ (K*F, w) MXU dot per layer.
    # TODO(synk): for much deeper configs switch to lax.fori_loop + pl.ds over
    # the layer axis to bound code size / vreg live ranges (neutral at depth 4).
    for l in range(n_rest):
        stack = jnp.concatenate([shifted(h, t) for t in range(ksize)], axis=0)
        h = jnp.dot(wr_ref[l], stack,
                    preferred_element_type=jnp.float32,
                    precision=jax.lax.Precision.HIGHEST) + br_ref[l]
        if l < n_rest - 1:                         # middle layers: folded BN + ReLU
            h = jnp.maximum(h, 0.0) * mask         # ReLU + re-zero halos

    o_ref[...] = h.astype(o_ref.dtype)             # single lane-dense store


# ----------------------------------------------------------------------------
# Parameter handling
# ----------------------------------------------------------------------------
def fold_bn(w, b, gamma, beta, mean, var, eps=1e-5):
    """Fold eval-mode BatchNorm1d into the preceding conv's weight/bias."""
    s = gamma / jnp.sqrt(var + eps)
    return w * s[:, None, None], (b - mean) * s + beta


def init_prior_cnn(key, num_features, kernel_size, conv_depth):
    """PyTorch-style uniform init; BN has fresh running stats (mean=0, var=1)."""
    f, k = num_features, kernel_size

    def conv_init(kk, c_in, c_out):
        k_w, k_b = jax.random.split(kk)
        bound = 1.0 / math.sqrt(c_in * k)
        w = jax.random.uniform(k_w, (c_out, c_in, k), jnp.float32, -bound, bound)
        b = jax.random.uniform(k_b, (c_out,), jnp.float32, -bound, bound)
        return w, b

    keys = jax.random.split(key, conv_depth)
    layers = []
    w, b = conv_init(keys[0], 1, f)
    layers.append(dict(w=w, b=b, bn=None, relu=False))
    for i in range(conv_depth - 2):
        w, b = conv_init(keys[1 + i], f, f)
        bn = (jnp.ones((f,), jnp.float32), jnp.zeros((f,), jnp.float32),
              jnp.zeros((f,), jnp.float32), jnp.ones((f,), jnp.float32))
        layers.append(dict(w=w, b=b, bn=bn, relu=True))
    w, b = conv_init(keys[conv_depth - 1], f, f)
    layers.append(dict(w=w, b=b, bn=None, relu=False))
    return layers


# ----------------------------------------------------------------------------
# Wrapper: fold BN, im2col-pack weights, pack batch into lanes, launch kernel.
# ----------------------------------------------------------------------------
def prior_cnn_forward(layers, x, *, lane_target=512):
    batch, c_in, n = x.shape
    assert c_in == 1, "PriorCNN takes a single input channel"
    f = layers[0]["w"].shape[0]
    k = layers[0]["w"].shape[2]
    pad = k // 2
    n_seg = n + 2 * pad                      # per-element padded segment length
    n_rest = len(layers) - 1

    # Batch elements per grid block: fill ~lane_target lanes, but keep at least
    # 2 grid steps when B >= 2 so both v7x TensorCores get work.
    bpb = max(1, min(batch, lane_target // n_seg))
    if batch >= 2:
        bpb = min(bpb, (batch + 1) // 2)
    grid_b = -(-batch // bpb)                # ceil(batch / bpb)
    w_blk = ((bpb * n_seg + 127) // 128) * 128   # lane-dense block width

    # ---- weights: tap-major first layer, im2col-packed (BN-folded) rest.
    w0 = jnp.transpose(layers[0]["w"], (2, 0, 1))          # (K, F, 1)
    b0 = layers[0]["b"].reshape(f, 1)
    wr_list, br_list = [], []
    for lyr in layers[1:]:
        w, b = lyr["w"], lyr["b"]
        if lyr["bn"] is not None:
            w, b = fold_bn(w, b, *lyr["bn"])
        # Wp[o, t*F + c] = w[o, c, t]  to match the in-kernel (K*F, W) stack.
        wr_list.append(jnp.transpose(w, (0, 2, 1)).reshape(f, k * f))
        br_list.append(b.reshape(f, 1))
    wr = jnp.stack(wr_list)                                 # (L, F, K*F)
    br = jnp.stack(br_list)                                 # (L, F, 1)

    # ---- pack the batch into lane-dense slabs with per-element zero halos.
    b_tot = grid_b * bpb
    x_rows = x[:, 0, :].astype(jnp.float32)                 # (B, N)
    x_rows = jnp.pad(x_rows, ((0, b_tot - batch), (0, 0)))
    x_seg = jnp.pad(x_rows, ((0, 0), (pad, pad)))           # (b_tot, n_seg)
    x_pack = x_seg.reshape(grid_b, bpb * n_seg)
    x_pack = jnp.pad(x_pack, ((0, 0), (0, w_blk - bpb * n_seg)))
    x_pack = x_pack[:, None, :]                              # (grid_b, 1, w_blk)

    cols = jnp.arange(w_blk)
    seg = cols % n_seg
    interior = (cols < bpb * n_seg) & (seg >= pad) & (seg < pad + n)
    mask = interior.astype(jnp.float32)[None, :]             # (1, w_blk)

    flops = 2 * batch * n * k * f * (1 + n_rest * f)
    bytes_accessed = 4 * (x_pack.size + mask.size + w0.size + b0.size
                          + wr.size + br.size + grid_b * f * w_blk)

    out_slab = pl.pallas_call(
        _prior_cnn_kernel,
        out_shape=jax.ShapeDtypeStruct((grid_b, f, w_blk), x.dtype),
        grid_spec=pltpu.PrefetchScalarGridSpec(
            num_scalar_prefetch=0,
            grid=(grid_b,),
            in_specs=[
                pl.BlockSpec((None, 1, w_blk), lambda g: (g, 0, 0)),
                pl.BlockSpec((1, w_blk), lambda g: (0, 0)),
                # Weights/biases are grid-invariant; at production F consider
                # single-buffering them (pipeline_mode=pl.Buffered(1)) to halve
                # their VMEM footprint.  Irrelevant at F=8.
                pl.BlockSpec((k, f, 1), lambda g: (0, 0, 0)),
                pl.BlockSpec((f, 1), lambda g: (0, 0)),
                pl.BlockSpec((n_rest, f, k * f), lambda g: (0, 0, 0)),
                pl.BlockSpec((n_rest, f, 1), lambda g: (0, 0, 0)),
            ],
            out_specs=pl.BlockSpec((None, f, w_blk), lambda g: (g, 0, 0)),
        ),
        compiler_params=pltpu.CompilerParams(
            dimension_semantics=("parallel",),
        ),
        cost_estimate=pl.CostEstimate(flops=int(flops), transcendentals=0,
                                      bytes_accessed=int(bytes_accessed)),
    )(x_pack, mask, w0, b0, wr, br)

    # ---- unpack: (grid_b, F, w_blk) -> (B, F, N)
    out = out_slab[:, :, :bpb * n_seg].reshape(grid_b, f, bpb, n_seg)
    out = out.transpose(0, 2, 1, 3).reshape(grid_b * bpb, f, n_seg)
    return out[:batch, :, pad:pad + n]


# ----------------------------------------------------------------------------
# Pure-JAX reference (exact f32) for validation.
# ----------------------------------------------------------------------------
def _conv1d_ref(x, w, b):
    c_out, _, k = w.shape
    pad = k // 2
    n = x.shape[-1]
    xp = jnp.pad(x, ((0, 0), (0, 0), (pad, pad)))
    acc = jnp.zeros((x.shape[0], c_out, n), jnp.float32) + b[None, :, None]
    for t in range(k):
        acc = acc + jnp.einsum("oi,bin->bon", w[:, :, t], xp[:, :, t:t + n],
                               precision=jax.lax.Precision.HIGHEST)
    return acc


def prior_cnn_reference(layers, x):
    h = x
    for lyr in layers:
        w, b = lyr["w"], lyr["b"]
        if lyr["bn"] is not None:
            w, b = fold_bn(w, b, *lyr["bn"])
        h = _conv1d_ref(h, w, b)
        if lyr["relu"]:
            h = jnp.maximum(h, 0.0)
    return h


if __name__ == "__main__":
    # opts: num_features=8, kernel_size=5, conv_depth=4 (small demo config)
    NUM_FEATURES, KERNEL_SIZE, CONV_DEPTH = 8, 5, 4
    B, N = 2, 16

    key = jax.random.PRNGKey(0)
    k_params, k_x = jax.random.split(key)
    layers = init_prior_cnn(k_params, NUM_FEATURES, KERNEL_SIZE, CONV_DEPTH)
    x = jax.random.normal(k_x, (B, 1, N), dtype=jnp.float32)

    out = prior_cnn_forward(layers, x)
    out = jax.block_until_ready(out)

    ref = prior_cnn_reference(layers, x)
    assert out.shape == (B, NUM_FEATURES, N), out.shape
    max_err = float(jnp.max(jnp.abs(out - ref)))
    assert jnp.allclose(out, ref, atol=1e-4, rtol=1e-4), f"mismatch, max_err={max_err}"

    print("KERNEL_OK")
</pallas_src>

<mosaic_0001>
module attributes {stable_mosaic.version = 11 : i64} {
  func.func @_prior_cnn_kernel(%arg0: i32, %arg1: memref<1x1x128xf32, #tpu.memory_space<vmem>>, %arg2: memref<1x128xf32, #tpu.memory_space<vmem>>, %arg3: memref<5x8x1xf32, #tpu.memory_space<vmem>>, %arg4: memref<8x1xf32, #tpu.memory_space<vmem>>, %arg5: memref<3x8x40xf32, #tpu.memory_space<vmem>>, %arg6: memref<3x8x1xf32, #tpu.memory_space<vmem>>, %arg7: memref<1x8x128xf32, #tpu.memory_space<vmem>>) attributes {dimension_semantics = [#tpu.dimension_semantics<parallel>], iteration_bounds = array<i64: 2>, scalar_prefetch = 0 : i64, scratch_operands = 0 : i64, tpu.core_type = #tpu.core_type<tc>, window_params = [{transform_indices = @transform_0, window_bounds = array<i64: 1, 1, 128>}, {pipeline_mode = #tpu.pipeline_mode<synchronous>, transform_indices = @transform_1, window_bounds = array<i64: 1, 128>}, {pipeline_mode = #tpu.pipeline_mode<synchronous>, transform_indices = @transform_2, window_bounds = array<i64: 5, 8, 1>}, {pipeline_mode = #tpu.pipeline_mode<synchronous>, transform_indices = @transform_3, window_bounds = array<i64: 8, 1>}, {pipeline_mode = #tpu.pipeline_mode<synchronous>, transform_indices = @transform_4, window_bounds = array<i64: 3, 8, 40>}, {pipeline_mode = #tpu.pipeline_mode<synchronous>, transform_indices = @transform_5, window_bounds = array<i64: 3, 8, 1>}, {transform_indices = @transform_6, window_bounds = array<i64: 1, 8, 128>}]} {
    %c0 = arith.constant 0 : index
    %c0_0 = arith.constant 0 : index
    %0 = vector.load %arg2[%c0, %c0_0] : memref<1x128xf32, #tpu.memory_space<vmem>>, vector<1x128xf32>
    %c0_1 = arith.constant 0 : index
    %c0_2 = arith.constant 0 : index
    %c0_3 = arith.constant 0 : index
    %1 = vector.load %arg1[%c0_1, %c0_2, %c0_3] : memref<1x1x128xf32, #tpu.memory_space<vmem>>, vector<1x1x128xf32>
    %2 = vector.shape_cast %1 : vector<1x1x128xf32> to vector<1x128xf32>
    %c0_4 = arith.constant 0 : index
    %c0_5 = arith.constant 0 : index
    %3 = vector.load %arg4[%c0_4, %c0_5] : memref<8x1xf32, #tpu.memory_space<vmem>>, vector<8x1xf32>
    %4 = vector.shape_cast %3 : vector<8x1xf32> to vector<8x1xf32>
    %5 = vector.broadcast %4 : vector<8x1xf32> to vector<8x128xf32>
    %c0_6 = arith.constant 0 : index
    %c0_7 = arith.constant 0 : index
    %c0_8 = arith.constant 0 : index
    %6 = vector.load %arg3[%c0_6, %c0_7, %c0_8] : memref<5x8x1xf32, #tpu.memory_space<vmem>>, vector<1x8x1xf32>
    %7 = vector.shape_cast %6 : vector<1x8x1xf32> to vector<8x1xf32>
    %c2_i32 = arith.constant 2 : i32
    %8 = tpu.dynamic_rotate %2 by %c2_i32 dim 1 : vector<1x128xf32>, i32 -> vector<1x128xf32>
    %9 = vector.broadcast %7 : vector<8x1xf32> to vector<8x128xf32>
    %10 = vector.broadcast %8 : vector<1x128xf32> to vector<8x128xf32>
    %11 = arith.mulf %9, %10 : vector<8x128xf32>
    %12 = arith.addf %5, %11 : vector<8x128xf32>
    %c1 = arith.constant 1 : index
    %c0_9 = arith.constant 0 : index
    %c0_10 = arith.constant 0 : index
    %13 = vector.load %arg3[%c1, %c0_9, %c0_10] : memref<5x8x1xf32, #tpu.memory_space<vmem>>, vector<1x8x1xf32>
    %14 = vector.shape_cast %13 : vector<1x8x1xf32> to vector<8x1xf32>
    %c1_i32 = arith.constant 1 : i32
    %15 = tpu.dynamic_rotate %2 by %c1_i32 dim 1 : vector<1x128xf32>, i32 -> vector<1x128xf32>
    %16 = vector.broadcast %14 : vector<8x1xf32> to vector<8x128xf32>
    %17 = vector.broadcast %15 : vector<1x128xf32> to vector<8x128xf32>
    %18 = arith.mulf %16, %17 : vector<8x128xf32>
    %19 = arith.addf %12, %18 : vector<8x128xf32>
    %c2 = arith.constant 2 : index
    %c0_11 = arith.constant 0 : index
    %c0_12 = arith.constant 0 : index
    %20 = vector.load %arg3[%c2, %c0_11, %c0_12] : memref<5x8x1xf32, #tpu.memory_space<vmem>>, vector<1x8x1xf32>
    %21 = vector.shape_cast %20 : vector<1x8x1xf32> to vector<8x1xf32>
    %22 = vector.broadcast %21 : vector<8x1xf32> to vector<8x128xf32>
    %23 = vector.broadcast %2 : vector<1x128xf32> to vector<8x128xf32>
    %24 = arith.mulf %22, %23 : vector<8x128xf32>
    %25 = arith.addf %19, %24 : vector<8x128xf32>
    %c3 = arith.constant 3 : index
    %c0_13 = arith.constant 0 : index
    %c0_14 = arith.constant 0 : index
    %26 = vector.load %arg3[%c3, %c0_13, %c0_14] : memref<5x8x1xf32, #tpu.memory_space<vmem>>, vector<1x8x1xf32>
    %27 = vector.shape_cast %26 : vector<1x8x1xf32> to vector<8x1xf32>
    %c127_i32 = arith.constant 127 : i32
    %28 = tpu.dynamic_rotate %2 by %c127_i32 dim 1 : vector<1x128xf32>, i32 -> vector<1x128xf32>
    %29 = vector.broadcast %27 : vector<8x1xf32> to vector<8x128xf32>
    %30 = vector.broadcast %28 : vector<1x128xf32> to vector<8x128xf32>
    %31 = arith.mulf %29, %30 : vector<8x128xf32>
    %32 = arith.addf %25, %31 : vector<8x128xf32>
    %c4 = arith.constant 4 : index
    %c0_15 = arith.constant 0 : index
    %c0_16 = arith.constant 0 : index
    %33 = vector.load %arg3[%c4, %c0_15, %c0_16] : memref<5x8x1xf32, #tpu.memory_space<vmem>>, vector<1x8x1xf32>
    %34 = vector.shape_cast %33 : vector<1x8x1xf32> to vector<8x1xf32>
    %c126_i32 = arith.constant 126 : i32
    %35 = tpu.dynamic_rotate %2 by %c126_i32 dim 1 : vector<1x128xf32>, i32 -> vector<1x128xf32>
    %36 = vector.broadcast %34 : vector<8x1xf32> to vector<8x128xf32>
    %37 = vector.broadcast %35 : vector<1x128xf32> to vector<8x128xf32>
    %38 = arith.mulf %36, %37 : vector<8x128xf32>
    %39 = arith.addf %32, %38 : vector<8x128xf32>
    %40 = vector.broadcast %0 : vector<1x128xf32> to vector<8x128xf32>
    %41 = arith.mulf %39, %40 : vector<8x128xf32>
    %c2_i32_17 = arith.constant 2 : i32
    %42 = tpu.dynamic_rotate %41 by %c2_i32_17 dim 1 : vector<8x128xf32>, i32 -> vector<8x128xf32>
    %c1_i32_18 = arith.constant 1 : i32
    %43 = tpu.dynamic_rotate %41 by %c1_i32_18 dim 1 : vector<8x128xf32>, i32 -> vector<8x128xf32>
    %c127_i32_19 = arith.constant 127 : i32
    %44 = tpu.dynamic_rotate %41 by %c127_i32_19 dim 1 : vector<8x128xf32>, i32 -> vector<8x128xf32>
    %c126_i32_20 = arith.constant 126 : i32
    %45 = tpu.dynamic_rotate %41 by %c126_i32_20 dim 1 : vector<8x128xf32>, i32 -> vector<8x128xf32>
    %46 = tpu.concatenate %42, %43, %41, %44, %45 in 0 : vector<8x128xf32>, vector<8x128xf32>, vector<8x128xf32>, vector<8x128xf32>, vector<8x128xf32> -> vector<40x128xf32>
    %c0_21 = arith.constant 0 : index
    %c0_22 = arith.constant 0 : index
    %c0_23 = arith.constant 0 : index
    %47 = vector.load %arg5[%c0_21, %c0_22, %c0_23] : memref<3x8x40xf32, #tpu.memory_space<vmem>>, vector<1x8x40xf32>
    %48 = vector.shape_cast %47 : vector<1x8x40xf32> to vector<8x40xf32>
    %cst = arith.constant dense<0.000000e+00> : vector<8x128xf32>
    %49 = tpu.matmul %48, %46, %cst {dimension_numbers = #tpu.dot_dimension_numbers<[1], [0], [0], [1], [0, 0, 1, 1], [], []>, precision = #tpu.contract_precision<fp32>} : vector<8x40xf32>, vector<40x128xf32>, vector<8x128xf32> -> vector<8x128xf32>
    %c0_24 = arith.constant 0 : index
    %c0_25 = arith.constant 0 : index
    %c0_26 = arith.constant 0 : index
    %50 = vector.load %arg6[%c0_24, %c0_25, %c0_26] : memref<3x8x1xf32, #tpu.memory_space<vmem>>, vector<1x8x1xf32>
    %51 = vector.shape_cast %50 : vector<1x8x1xf32> to vector<8x1xf32>
    %52 = vector.broadcast %51 : vector<8x1xf32> to vector<8x128xf32>
    %53 = arith.addf %49, %52 : vector<8x128xf32>
    %cst_27 = arith.constant 0.000000e+00 : f32
    %54 = vector.broadcast %cst_27 : f32 to vector<8x128xf32>
    %55 = arith.maximumf %53, %54 : vector<8x128xf32>
    %56 = vector.broadcast %0 : vector<1x128xf32> to vector<8x128xf32>
    %57 = arith.mulf %55, %56 : vector<8x128xf32>
    %c2_i32_28 = arith.constant 2 : i32
    %58 = tpu.dynamic_rotate %57 by %c2_i32_28 dim 1 : vector<8x128xf32>, i32 -> vector<8x128xf32>
    %c1_i32_29 = arith.constant 1 : i32
    %59 = tpu.dynamic_rotate %57 by %c1_i32_29 dim 1 : vector<8x128xf32>, i32 -> vector<8x128xf32>
    %c127_i32_30 = arith.constant 127 : i32
    %60 = tpu.dynamic_rotate %57 by %c127_i32_30 dim 1 : vector<8x128xf32>, i32 -> vector<8x128xf32>
    %c126_i32_31 = arith.constant 126 : i32
    %61 = tpu.dynamic_rotate %57 by %c126_i32_31 dim 1 : vector<8x128xf32>, i32 -> vector<8x128xf32>
    %62 = tpu.concatenate %58, %59, %57, %60, %61 in 0 : vector<8x128xf32>, vector<8x128xf32>, vector<8x128xf32>, vector<8x128xf32>, vector<8x128xf32> -> vector<40x128xf32>
    %c1_32 = arith.constant 1 : index
    %c0_33 = arith.constant 0 : index
    %c0_34 = arith.constant 0 : index
    %63 = vector.load %arg5[%c1_32, %c0_33, %c0_34] : memref<3x8x40xf32, #tpu.memory_space<vmem>>, vector<1x8x40xf32>
    %64 = vector.shape_cast %63 : vector<1x8x40xf32> to vector<8x40xf32>
    %cst_35 = arith.constant dense<0.000000e+00> : vector<8x128xf32>
    %65 = tpu.matmul %64, %62, %cst_35 {dimension_numbers = #tpu.dot_dimension_numbers<[1], [0], [0], [1], [0, 0, 1, 1], [], []>, precision = #tpu.contract_precision<fp32>} : vector<8x40xf32>, vector<40x128xf32>, vector<8x128xf32> -> vector<8x128xf32>
    %c1_36 = arith.constant 1 : index
    %c0_37 = arith.constant 0 : index
    %c0_38 = arith.constant 0 : index
    %66 = vector.load %arg6[%c1_36, %c0_37, %c0_38] : memref<3x8x1xf32, #tpu.memory_space<vmem>>, vector<1x8x1xf32>
    %67 = vector.shape_cast %66 : vector<1x8x1xf32> to vector<8x1xf32>
    %68 = vector.broadcast %67 : vector<8x1xf32> to vector<8x128xf32>
    %69 = arith.addf %65, %68 : vector<8x128xf32>
    %cst_39 = arith.constant 0.000000e+00 : f32
    %70 = vector.broadcast %cst_39 : f32 to vector<8x128xf32>
    %71 = arith.maximumf %69, %70 : vector<8x128xf32>
    %72 = vector.broadcast %0 : vector<1x128xf32> to vector<8x128xf32>
    %73 = arith.mulf %71, %72 : vector<8x128xf32>
    %c2_i32_40 = arith.constant 2 : i32
    %74 = tpu.dynamic_rotate %73 by %c2_i32_40 dim 1 : vector<8x128xf32>, i32 -> vector<8x128xf32>
    %c1_i32_41 = arith.constant 1 : i32
    %75 = tpu.dynamic_rotate %73 by %c1_i32_41 dim 1 : vector<8x128xf32>, i32 -> vector<8x128xf32>
    %c127_i32_42 = arith.constant 127 : i32
    %76 = tpu.dynamic_rotate %73 by %c127_i32_42 dim 1 : vector<8x128xf32>, i32 -> vector<8x128xf32>
    %c126_i32_43 = arith.constant 126 : i32
    %77 = tpu.dynamic_rotate %73 by %c126_i32_43 dim 1 : vector<8x128xf32>, i32 -> vector<8x128xf32>
    %78 = tpu.concatenate %74, %75, %73, %76, %77 in 0 : vector<8x128xf32>, vector<8x128xf32>, vector<8x128xf32>, vector<8x128xf32>, vector<8x128xf32> -> vector<40x128xf32>
    %c2_44 = arith.constant 2 : index
    %c0_45 = arith.constant 0 : index
    %c0_46 = arith.constant 0 : index
    %79 = vector.load %arg5[%c2_44, %c0_45, %c0_46] : memref<3x8x40xf32, #tpu.memory_space<vmem>>, vector<1x8x40xf32>
    %80 = vector.shape_cast %79 : vector<1x8x40xf32> to vector<8x40xf32>
    %cst_47 = arith.constant dense<0.000000e+00> : vector<8x128xf32>
    %81 = tpu.matmul %80, %78, %cst_47 {dimension_numbers = #tpu.dot_dimension_numbers<[1], [0], [0], [1], [0, 0, 1, 1], [], []>, precision = #tpu.contract_precision<fp32>} : vector<8x40xf32>, vector<40x128xf32>, vector<8x128xf32> -> vector<8x128xf32>
    %c2_48 = arith.constant 2 : index
    %c0_49 = arith.constant 0 : index
    %c0_50 = arith.constant 0 : index
    %82 = vector.load %arg6[%c2_48, %c0_49, %c0_50] : memref<3x8x1xf32, #tpu.memory_space<vmem>>, vector<1x8x1xf32>
    %83 = vector.shape_cast %82 : vector<1x8x1xf32> to vector<8x1xf32>
    %84 = vector.broadcast %83 : vector<8x1xf32> to vector<8x128xf32>
    %85 = arith.addf %81, %84 : vector<8x128xf32>
    %c0_51 = arith.constant 0 : index
    %c0_52 = arith.constant 0 : index
    %c0_53 = arith.constant 0 : index
    %86 = vector.load %arg7[%c0_51, %c0_52, %c0_53] : memref<1x8x128xf32, #tpu.memory_space<vmem>>, vector<1x8x128xf32>
    %87 = vector.shape_cast %86 : vector<1x8x128xf32> to vector<8x128xf32>
    %88 = vector.shape_cast %85 : vector<8x128xf32> to vector<1x8x128xf32>
    tpu.vector_store %arg7[%c0_51, %c0_52, %c0_53], %88 {strides = array<i32>} : memref<1x8x128xf32, #tpu.memory_space<vmem>>, vector<1x8x128xf32>,
    return
  }
  func.func @transform_0(%arg0: i32) -> (i32, i32, i32) {
    %c0_i32 = arith.constant 0 : i32
    %c0_i32_0 = arith.constant 0 : i32
    %c0_i32_1 = arith.constant 0 : i32
    return %arg0, %c0_i32, %c0_i32_0 : i32, i32, i32
  }
  func.func @transform_1(%arg0: i32) -> (i32, i32) {
    %c0_i32 = arith.constant 0 : i32
    %c0_i32_0 = arith.constant 0 : i32
    %c0_i32_1 = arith.constant 0 : i32
    return %c0_i32, %c0_i32_0 : i32, i32
  }
  func.func @transform_2(%arg0: i32) -> (i32, i32, i32) {
    %c0_i32 = arith.constant 0 : i32
    %c0_i32_0 = arith.constant 0 : i32
    %c0_i32_1 = arith.constant 0 : i32
    %c0_i32_2 = arith.constant 0 : i32
    return %c0_i32, %c0_i32_0, %c0_i32_1 : i32, i32, i32
  }
  func.func @transform_3(%arg0: i32) -> (i32, i32) {
    %c0_i32 = arith.constant 0 : i32
    %c0_i32_0 = arith.constant 0 : i32
    %c0_i32_1 = arith.constant 0 : i32
    return %c0_i32, %c0_i32_0 : i32, i32
  }
  func.func @transform_4(%arg0: i32) -> (i32, i32, i32) {
    %c0_i32 = arith.constant 0 : i32
    %c0_i32_0 = arith.constant 0 : i32
    %c0_i32_1 = arith.constant 0 : i32
    %c0_i32_2 = arith.constant 0 : i32
    return %c0_i32, %c0_i32_0, %c0_i32_1 : i32, i32, i32
  }
  func.func @transform_5(%arg0: i32) -> (i32, i32, i32) {
    %c0_i32 = arith.constant 0 : i32
    %c0_i32_0 = arith.constant 0 : i32
    %c0_i32_1 = arith.constant 0 : i32
    %c0_i32_2 = arith.constant 0 : i32
    return %c0_i32, %c0_i32_0, %c0_i32_1 : i32, i32, i32
  }
  func.func @transform_6(%arg0: i32) -> (i32, i32, i32) {
    %c0_i32 = arith.constant 0 : i32
    %c0_i32_0 = arith.constant 0 : i32
    %c0_i32_1 = arith.constant 0 : i32
    return %arg0, %c0_i32, %c0_i32_0 : i32, i32, i32
  }
}

</mosaic_0001>

<bundles_post_ra>
// kernel: tpu_custom_call.1
= control target key start
LH: loop header
LB: loop body
LE: loop exit
PB: predicated region body
PF: predicated region fallthrough
CT: control target
= control target key end

     0   :  { %11 = vsyncpa [#allocation3], 0  ;;  %s1391_s0 = inlined_call_operand.vmem [shape: f32[2,1,128], index: 0, kind: input, shape index: {}]   ;;  %s1392_s1 = inlined_call_operand.vmem [shape: f32[1,128], index: 1, kind: input, shape index: {}]   ;;  %s1393_s2 = inlined_call_operand.vmem [shape: f32[5,8,1], index: 2, kind: input, shape index: {}]   ;;  %s1394_s3 = inlined_call_operand.vmem [shape: f32[8,1], index: 3, kind: input, shape index: {}]   ;;  %s1395_s4 = inlined_call_operand.vmem [shape: f32[3,8,40], index: 4, kind: input, shape index: {}]   ;;  %s1396_s5 = inlined_call_operand.vmem [shape: f32[3,8,1], index: 5, kind: input, shape index: {}]   ;;  %s1397_s6 = inlined_call_operand.hbm [shape: f32[2,8,128], index: 6, kind: output, shape index: {}]  }
   0x1   :  { %13 = vsyncpa [#allocation3 + $0x1], 0  ;;  %s1215_s21 = smov 0   ;;  %s1217_s22 = smov 0  }
   0x2   :  { %s1219_s23 = smov 0   ;;  %s1221_s24 = smov 0  }
   0x3 LB: > { %s1236_s25 = sadd.s32 4294967295, %s1173_s24   ;;  %s1045_s26 = sadd.s32 4294967294, %s1173_s24   ;;  %s1173_s24 = sphi %s1221_s24, %s1403_s24   ;;  %s1169_s23 = sphi %s1219_s23, %s1402_s23   ;;  %s1165_s22 = sphi %s1217_s22, %s1401_s22   ;;  %s1161_s21 = sphi %s1215_s21, %s1400_s21  }
   0x4   : > { %s1240_s27 = sadd.s32 1, %s1173_s24   ;;  %s157_s28 = sadd.s32 1, %s1169_s23 }
   0x5   : > { %s154_s29 = ssub.s32 %s1173_s24, %s1240_s27  ;;  %p167_p0 = scmp.ne.s32.totalorder %s1169_s23, %s1165_s22 }
   0x6   : > { %p155_p1 = scmp.eq.s32.totalorder %s154_s29, 0  ;;  %p168_p2 = scmp.eq.s32.totalorder %s1236_s25, 1 }
   0x7   : > { %p173_p3 = scmp.ne.s32.totalorder %s1165_s22, %s1161_s21  ;;  %p174_p4 = scmp.eq.s32.totalorder %s1045_s26, 1 }
   0x8   : > { %s1251_s30 = scalar_select %p155_p1, %s1169_s23, %s157_s28  }
   0x9   : > { %p1253_p5 = por %p168_p2, %p167_p0  ;;  %p1257_p6 = por %p174_p4, %p173_p3 }
   0xa   : > { %p1048_p7 = scmp.ge.s32.totalorder %s1173_s24, 1  ;;  %p213_p8 = scmp.lt.s32.totalorder %s1173_s24, 3 }
   0xc   : > { %p214_p9 = pnand %p1048_p7, %p213_p8 }
   0xd   : > { %p241_p10 = scmp.lt.s32.totalorder (!%p214_p9), %s1236_s25, 1  ;;  %s1176_s15 = smov (!%p214_p9), 1  }
   0xe   : > { %217 = sbr.rel (%p214_p9) target bundleno = 1001 (0x3e9), region = 44  ;;  %s1177_s16 = smov (!%p214_p9), 2  }
   0xf   : > { %s1178_s10 = smov (!%p214_p9), 127   ;;  %s1131_s18 = scalar_lea.hbm (!%p214_p9), %s1397_s6, 16 }
  0x13   : > { %v1050_v0 = vld [vmem:[%s1393_s2 + $0x8] sm:$0xff]  ;;  %v1175_v1 = vmov 0   ;;  %s242_s11 = scalar_select %p241_p10, %s1236_s25, 1  ;;  %v1051_v3 = vld [vmem:[%s1393_s2 + $0x10] sm:$0xff]  ;;  %v246_v4 = vld [vmem:[%s1394_s3] sm:$0xff]  ;;  %vm330_vm0 = vcmask 326656  }
  0x14   : > { %1107 = vset.pattern.permute.xlu1 %v1175_v1  ;;  %1106 = vset.pattern.permute.xlu0 %v1175_v1  ;;  %v252_v5 = vld [vmem:[%s1393_s2] sm:$0xff]  ;;  %v1052_v6 = vld [vmem:[%s1393_s2 + $0x18] sm:$0xff] }
  0x15   : > { %1108 = vset.pattern.permute.xlu2 %v1175_v1  ;;  %s1271_s14 = scalar_lea.vmem %s1391_s0, %s242_s11  ;;  %s1179_s11 = smov 126   ;;  %v1053_v7 = vld [vmem:[%s1393_s2 + $0x20] sm:$0xff] }
  0x16   : > { %269 = vperm.xlu2 %1108, %v1050_v0   ;;  %v245_v2 = vld [vmem:[%s1271_s14] sm:$0x1] }
  0x17   : > { %265 = vrot.lane.b32.xlu1 %v245_v2, %s1176_s15  ;;  %253 = vrot.lane.b32.xlu0 %v245_v2, %s1177_s16  ;;  %v1109_v19 = vld [vmem:[%s1271_s14] ss:$0 sm:$0xff] }
  0x18   : > { %v1297_v30 = vld [vmem:[%s1392_s1] ss:$0 sm:$0xff] }
  0x19   : > { %v324_v35 = vld [vmem:[%s1396_s5] sm:$0xff] }
  0x1a   : > { %v323_v41 = vld [vmem:[%s1395_s4] sm:$0xff] }
  0x1b   : > { %v332_v43 = vsel %vm330_vm0, %v323_v41, 0 }
  0x1c   : > { %v355_v44 = vand.u32 4294901760, %v332_v43 }
  0x1e   : > { %279 = vperm.xlu2 %1108, %v1051_v3   ;;  %v356_v45 = vsub.f32 %v332_v43, %v355_v44 }
  0x1f   : > { %249 = vperm.xlu1 %1107, %v246_v4   ;;  %257 = vperm.xlu0 %1106, %v252_v5  }
  0x20   : > { %v357_v48 = vand.u32 4294901760, %v356_v45 }
  0x22   : > { %v358_v55 = vsub.f32 %v356_v45, %v357_v48 }
  0x24   : > { %v359_v62 = vand.u32 4294901760, %v358_v55 }
  0x26   : > { %293 = vperm.xlu2 %1108, %v1052_v6  }
  0x27   : > { %289 = vrot.lane.b32.xlu1 %v245_v2, %s1178_s10  ;;  %301 = vrot.lane.b32.xlu0 %v245_v2, %s1179_s11 }
  0x2f   : > { %305 = vperm.xlu1 %1107, %v1053_v7  }
  0x70   : > { %v270_v8 = vpop.permute.xlu2 %269 }
  0x78   : > { %v280_v14 = vpop.permute.xlu2 %279 }
  0x79   : > { %v285_v25 = vmul.f32 %v1109_v19, %v280_v14 }
  0x80   : > { %v294_v24 = vpop.permute.xlu2 %293 }
  0x89   : > { %v266_v9 = vpop.permute.xlu1 %265  ;;  %v254_v10 = vpop.permute.xlu0 %253 }
  0x8a   : > { %v260_v11 = vperm.slane %v254_v10, 0  ;;  %v272_v16 = vperm.slane %v266_v9, 0 }
  0x8c   : > { %v273_v20 = vmul.f32 %v272_v16, %v270_v8 }
  0x91   : > { %v250_v12 = vpop.permute.xlu1 %249  ;;  %v258_v13 = vpop.permute.xlu0 %257 }
  0x92   : > { %v261_v15 = vmul.f32 %v260_v11, %v258_v13 }
  0x94   : > { %v262_v17 = vadd.f32 %v261_v15, %v250_v12 }
  0x96   : > { %v274_v23 = vadd.f32 %v273_v20, %v262_v17 }
  0x98   : > { %v286_v28 = vadd.f32 %v285_v25, %v274_v23  ;;  %v1055_v23 = vld [vmem:[%s1396_s5 + $0x8] sm:$0xff] }
  0x99   : > { %v290_v18 = vpop.permute.xlu1 %289  ;;  %v302_v22 = vpop.permute.xlu0 %301 }
  0x9a   : > { %v296_v21 = vperm.slane %v290_v18, 0  ;;  %v308_v27 = vperm.slane %v302_v22, 0 }
  0x9c   : > { %v297_v26 = vmul.f32 %v296_v21, %v294_v24  ;;  %v1054_v24 = vld [vmem:[%s1395_s4 + $0x8] sm:$0xff] }
  0x9d   : > { %v552_v25 = vsel %vm330_vm0, %v1054_v24, 0 }
  0x9e   : > { %v298_v31 = vadd.f32 %v297_v26, %v286_v28 }
  0xa1   : > { %v306_v29 = vpop.permute.xlu1 %305 }
  0xa2   : > { %v309_v32 = vmul.f32 %v308_v27, %v306_v29  ;;  %v1329_v27 = vand.u32 4294901760, %v552_v25 }
  0xa4   : > { %v310_v33 = vadd.f32 %v309_v32, %v298_v31  ;;  %v576_v31 = vsub.f32 %v552_v25, %v1329_v27 }
  0xa6   : > { %v314_v34 = vmul.f32 %v1297_v30, %v310_v33 }
  0xa8   : > { %317 = vrot.lane.b32.xlu1 %v314_v34, %s1176_s15  ;;  %319 = vrot.lane.b32.xlu0 %v314_v34, %s1178_s10  ;;  %v349_v46 = vand.u32 4294901760, %v314_v34 }
  0xa9   : > { %321 = vrot.lane.b32.xlu2 %v314_v34, %s1179_s11 }
  0xaa   : > { %v388_v50 = vsub.f32 %v314_v34, %v349_v46 }
  0xac   : > { %v389_v59 = vand.u32 4294901760, %v388_v50 }
  0xae   : > { %v390_v0 = vsub.f32 %v388_v50, %v389_v59 }
  0xb0   : > { %327 = vperm.xlu0 %1106, %v324_v35   ;;  %v391_v4 = vand.u32 4294901760, %v390_v0 }
  0xb1   : > { %315 = vrot.lane.b32.xlu2 %v314_v34, %s1177_s16 }
 0x103   : > { %v322_v36 = vpop.permute.xlu2 %321 }
 0x104   : > { %v1307_v37 = vand.u32 4294901760, %v322_v36 }
 0x106   : > { %v376_v38 = vsub.f32 %v322_v36, %v1307_v37  ;;  %346 = vmatpush.msra.mxu0 %v1307_v37  ;;  %454 = vmatpush.msra.mxu3 %v1307_v37 }
 0x108   : > { %423 = vmatpush.msra.mxu2 %v376_v38  ;;  %v377_v39 = vand.u32 4294901760, %v376_v38 }
 0x10a   : > { %v378_v40 = vsub.f32 %v376_v38, %v377_v39  ;;  %v577_v38 = vand.u32 4294901760, %v576_v31 }
 0x10b   : > { %v316_v47 = vpop.permute.xlu2 %315 }
 0x10c   : > { %v379_v42 = vand.u32 4294901760, %v378_v40  ;;  %v353_v49 = vand.u32 4294901760, %v316_v47  ;;  %v578_v43 = vsub.f32 %v576_v31, %v577_v38 }
 0x10e   : > { %380 = vmatpush.msra.mxu1 %v379_v42  ;;  %v400_v56 = vsub.f32 %v316_v47, %v353_v49 }
 0x110   : > { %v401_v1 = vand.u32 4294901760, %v400_v56 }
 0x112   : > { %v402_v5 = vsub.f32 %v400_v56, %v401_v1 }
 0x114   : > { %v403_v7 = vand.u32 4294901760, %v402_v5 }
 0x11a   : > { %v318_v51 = vpop.permute.xlu1 %317  ;;  %v320_v52 = vpop.permute.xlu0 %319 }
 0x11b   : > { %v351_v53 = vand.u32 4294901760, %v318_v51  ;;  %v347_v54 = vand.u32 4294901760, %v320_v52 }
 0x11d   : > { %v394_v57 = vsub.f32 %v318_v51, %v351_v53  ;;  %v382_v58 = vsub.f32 %v320_v52, %v347_v54  ;;  %348 = vmatpush.msra.mxu0 %v347_v54  ;;  %456 = vmatpush.msra.mxu3 %v347_v54  ;;  %v579_v51 = vand.u32 4294901760, %v578_v43 }
 0x11f   : > { %350 = vmatpush.msra.mxu0 %v349_v46  ;;  %426 = vmatpush.msra.mxu2 %v382_v58  ;;  %v383_v60 = vand.u32 4294901760, %v382_v58  ;;  %v395_v61 = vand.u32 4294901760, %v394_v57 }
 0x120   : > { %458 = vmatpush.msra.mxu3 %v349_v46 }
 0x121   : > { %352 = vmatpush.msra.mxu0 %v351_v53  ;;  %429 = vmatpush.msra.mxu2 %v388_v50  ;;  %v384_v63 = vsub.f32 %v382_v58, %v383_v60  ;;  %v396_v3 = vsub.f32 %v394_v57, %v395_v61 }
 0x122   : > { %460 = vmatpush.msra.mxu3 %v351_v53  ;;  %v328_v9 = vpop.permute.xlu0 %327 }
 0x123   : > { %354 = vmatpush.msra.mxu0 %v353_v49  ;;  %432 = vmatpush.msra.mxu2 %v394_v57  ;;  %v385_v2 = vand.u32 4294901760, %v384_v63  ;;  %v397_v6 = vand.u32 4294901760, %v396_v3 }
 0x124   : > { %462 = vmatpush.msra.mxu3 %v353_v49  ;;  %360 = vmatmul.f32.vlgmr.msra.gmra.mxu0 %v359_v62 }
 0x125   : > { %484 = vmatpush.msrb.mxu0 %v377_v39  ;;  %386 = vmatpush.msra.mxu1 %v385_v2 }
 0x126   : > { %435 = vmatpush.msra.mxu2 %v400_v56  ;;  %466 = vmatmul.f32.vlgmr.msra.gmra.mxu3 %v357_v48 }
 0x127   : > { %488 = vmatpush.msrb.mxu0 %v383_v60  ;;  %392 = vmatpush.msra.mxu1 %v391_v4 }
 0x128   : > { %438 = vmatmul.f32.vlgmr.msra.gmra.mxu2 %v356_v45 }
 0x129   : > { %492 = vmatpush.msrb.mxu0 %v389_v59  ;;  %398 = vmatpush.msra.mxu1 %v397_v6 }
 0x12b   : > { %496 = vmatpush.msrb.mxu0 %v395_v61  ;;  %404 = vmatpush.msra.mxu1 %v403_v7 }
 0x12c   : > { %406 = vmatmul.f32.vlgmr.msra.gmra.mxu1 %v355_v44 }
 0x12d   : > { %500 = vmatpush.msrb.mxu0 %v401_v1  ;;  %518 = vmatpush.msrb.mxu1 %v1307_v37 }
 0x12e   : > { %502 = vmatmul.f32.vlgmr.msrb.gmra.mxu0 %v355_v44 }
 0x12f   : > { %520 = vmatpush.msrb.mxu1 %v347_v54 }
 0x131   : > { %522 = vmatpush.msrb.mxu1 %v349_v46 }
 0x133   : > { %524 = vmatpush.msrb.mxu1 %v351_v53 }
 0x135   : > { %526 = vmatpush.msrb.mxu1 %v353_v49 }
 0x136   : > { %528 = vmatmul.f32.vlgmr.msrb.gmra.mxu1 %v355_v44 }
 0x1a1   : > { %v361_v8 = vpop.f32.mrf.mxu0 }
 0x1a2   : > { %v362_v10 = vadd.f32 %v361_v8, %v328_v9 }
 0x1a9   : > { %v407_v11 = vpop.f32.mrf.mxu1  ;;  %v467_v14 = vpop.f32.mrf.mxu3 }
 0x1aa   : > { %v408_v12 = vadd.f32 %v407_v11, %v362_v10 }
 0x1ab   : > { %v439_v13 = vpop.f32.mrf.mxu2  ;;  %v503_v16 = vpop.f32.mrf.mxu0 }
 0x1ac   : > { %v440_v15 = vadd.f32 %v439_v13, %v408_v12  ;;  %v1057_v12 = vld [vmem:[%s1396_s5 + $0x10] sm:$0xff] }
 0x1ad   : > { %v1056_v13 = vld [vmem:[%s1395_s4 + $0x10] sm:$0xff] }
 0x1ae   : > { %v468_v17 = vadd.f32 %v467_v14, %v440_v15  ;;  %v772_v14 = vsel %vm330_vm0, %v1056_v13, 0 }
 0x1b0   : > { %v504_v18 = vadd.f32 %v503_v16, %v468_v17 }
 0x1b3   : > { %v529_v19 = vpop.f32.mrf.mxu1 }
 0x1b4   : > { %v530_v20 = vadd.f32 %v529_v19, %v504_v18 }
 0x1b6   : > { %v532_v21 = vmax.f32 %v530_v20, 0.0 }
 0x1b8   : > { %v533_v22 = vmul.f32 %v1297_v30, %v532_v21 }
 0x1ba   : > { %536 = vrot.lane.b32.xlu0 %v533_v22, %s1176_s15  ;;  %538 = vrot.lane.b32.xlu2 %v533_v22, %s1178_s10  ;;  %v569_v29 = vand.u32 4294901760, %v533_v22 }
 0x1bb   : > { %540 = vrot.lane.b32.xlu1 %v533_v22, %s1179_s11 }
 0x1bc   : > { %v608_v37 = vsub.f32 %v533_v22, %v569_v29 }
 0x1be   : > { %v609_v44 = vand.u32 4294901760, %v608_v37 }
 0x1c0   : > { %v610_v52 = vsub.f32 %v608_v37, %v609_v44 }
 0x1c2   : > { %548 = vperm.xlu2 %1108, %v1055_v23   ;;  %v611_v56 = vand.u32 4294901760, %v610_v52 }
 0x1c3   : > { %534 = vrot.lane.b32.xlu1 %v533_v22, %s1177_s16 }
 0x214   : > { %v539_v26 = vpop.permute.xlu2 %538 }
 0x215   : > { %v567_v28 = vand.u32 4294901760, %v539_v26 }
 0x217   : > { %v602_v32 = vsub.f32 %v539_v26, %v567_v28 }
 0x219   : > { %v603_v41 = vand.u32 4294901760, %v602_v32 }
 0x21b   : > { %v604_v46 = vsub.f32 %v602_v32, %v603_v41 }
 0x21c   : > { %v549_v62 = vpop.permute.xlu2 %548 }
 0x21d   : > { %v605_v54 = vand.u32 4294901760, %v604_v46 }
 0x22c   : > { %v537_v33 = vpop.permute.xlu0 %536 }
 0x22d   : > { %v571_v34 = vand.u32 4294901760, %v537_v33  ;;  %v541_v35 = vpop.permute.xlu1 %540 }
 0x22e   : > { %v565_v36 = vand.u32 4294901760, %v541_v35 }
 0x22f   : > { %v614_v39 = vsub.f32 %v537_v33, %v571_v34 }
 0x230   : > { %v596_v40 = vsub.f32 %v541_v35, %v565_v36  ;;  %566 = vmatpush.msrb.mxu2 %v565_v36  ;;  %674 = vmatpush.msra.mxu1 %v565_v36 }
 0x231   : > { %v615_v47 = vand.u32 4294901760, %v614_v39 }
 0x232   : > { %568 = vmatpush.msrb.mxu2 %v567_v28  ;;  %643 = vmatpush.msra.mxu0 %v596_v40  ;;  %v597_v42 = vand.u32 4294901760, %v596_v40 }
 0x233   : > { %676 = vmatpush.msra.mxu1 %v567_v28  ;;  %v616_v55 = vsub.f32 %v614_v39, %v615_v47 }
 0x234   : > { %570 = vmatpush.msrb.mxu2 %v569_v29  ;;  %646 = vmatpush.msra.mxu0 %v602_v32  ;;  %v598_v45 = vsub.f32 %v596_v40, %v597_v42 }
 0x235   : > { %678 = vmatpush.msra.mxu1 %v569_v29  ;;  %v535_v48 = vpop.permute.xlu1 %534  ;;  %v617_v58 = vand.u32 4294901760, %v616_v55 }
 0x236   : > { %v573_v49 = vand.u32 4294901760, %v535_v48  ;;  %572 = vmatpush.msrb.mxu2 %v571_v34  ;;  %649 = vmatpush.msra.mxu0 %v608_v37  ;;  %v599_v50 = vand.u32 4294901760, %v598_v45 }
 0x237   : > { %680 = vmatpush.msra.mxu1 %v571_v34 }
 0x238   : > { %v620_v53 = vsub.f32 %v535_v48, %v573_v49  ;;  %574 = vmatpush.msrb.mxu2 %v573_v49  ;;  %600 = vmatpush.msrb.mxu3 %v599_v50 }
 0x239   : > { %652 = vmatpush.msra.mxu0 %v614_v39  ;;  %682 = vmatpush.msra.mxu1 %v573_v49 }
 0x23a   : > { %580 = vmatmul.f32.vlgmr.msrb.gmra.mxu2 %v579_v51  ;;  %606 = vmatpush.msrb.mxu3 %v605_v54  ;;  %v621_v57 = vand.u32 4294901760, %v620_v53 }
 0x23b   : > { %704 = vmatpush.msra.mxu2 %v597_v42  ;;  %655 = vmatpush.msra.mxu0 %v620_v53 }
 0x23c   : > { %612 = vmatpush.msrb.mxu3 %v611_v56  ;;  %v622_v59 = vsub.f32 %v620_v53, %v621_v57  ;;  %658 = vmatmul.f32.vlgmr.msra.gmra.mxu0 %v576_v31 }
 0x23d   : > { %708 = vmatpush.msra.mxu2 %v603_v41  ;;  %686 = vmatmul.f32.vlgmr.msra.gmra.mxu1 %v577_v38 }
 0x23e   : > { %618 = vmatpush.msrb.mxu3 %v617_v58  ;;  %v623_v60 = vand.u32 4294901760, %v622_v59 }
 0x23f   : > { %712 = vmatpush.msra.mxu2 %v609_v44 }
 0x240   : > { %624 = vmatpush.msrb.mxu3 %v623_v60 }
 0x241   : > { %716 = vmatpush.msra.mxu2 %v615_v47  ;;  %626 = vmatmul.f32.vlgmr.msrb.gmra.mxu3 %v1329_v27 }
 0x242   : > { %738 = vmatpush.msra.mxu3 %v565_v36 }
 0x243   : > { %720 = vmatpush.msra.mxu2 %v621_v57 }
 0x244   : > { %740 = vmatpush.msra.mxu3 %v567_v28  ;;  %722 = vmatmul.f32.vlgmr.msra.gmra.mxu2 %v1329_v27 }
 0x246   : > { %742 = vmatpush.msra.mxu3 %v569_v29 }
 0x248   : > { %744 = vmatpush.msra.mxu3 %v571_v34 }
 0x24a   : > { %746 = vmatpush.msra.mxu3 %v573_v49 }
 0x24b   : > { %748 = vmatmul.f32.vlgmr.msra.gmra.mxu3 %v1329_v27 }
 0x2b9   : > { %v659_v1 = vpop.f32.mrf.mxu0 }
 0x2ba   : > { %v687_v3 = vpop.f32.mrf.mxu1 }
 0x2bd   : > { %v581_v61 = vpop.f32.mrf.mxu2 }
 0x2be   : > { %v582_v63 = vadd.f32 %v581_v61, %v549_v62 }
 0x2c4   : > { %v627_v0 = vpop.f32.mrf.mxu3 }
 0x2c5   : > { %v628_v2 = vadd.f32 %v627_v0, %v582_v63 }
 0x2c7   : > { %v660_v4 = vadd.f32 %v659_v1, %v628_v2  ;;  %v723_v5 = vpop.f32.mrf.mxu2 }
 0x2c9   : > { %v688_v6 = vadd.f32 %v687_v3, %v660_v4 }
 0x2cb   : > { %v724_v7 = vadd.f32 %v723_v5, %v688_v6 }
 0x2ce   : > { %v749_v8 = vpop.f32.mrf.mxu3 }
 0x2cf   : > { %v750_v9 = vadd.f32 %v749_v8, %v724_v7 }
 0x2d1   : > { %v752_v10 = vmax.f32 %v750_v9, 0.0 }
 0x2d3   : > { %v753_v11 = vmul.f32 %v1297_v30, %v752_v10  ;;  %v1347_v30 = vand.u32 4294901760, %v772_v14 }
 0x2d5   : > { %756 = vrot.lane.b32.xlu2 %v753_v11, %s1176_s15  ;;  %758 = vrot.lane.b32.xlu1 %v753_v11, %s1178_s10  ;;  %v1349_v16 = vand.u32 4294901760, %v753_v11  ;;  %v796_v17 = vsub.f32 %v772_v14, %v1347_v30  ;;  %s238_s15 = sand.u32 1, %s1165_s22   ;;  %s1059_s10 = sshll.u32 %s1236_s25, 3 }
 0x2d6   : > { %760 = vrot.lane.b32.xlu0 %v753_v11, %s1179_s11  ;;  %s984_s20 = scalar_lea.hbm %s1397_s6, %s1059_s10  ;;  %s974_s9 = scalar_lea.sflag [#allocation3], %s238_s15 }
 0x2d7   : > { %v828_v23 = vsub.f32 %v753_v11, %v1349_v16  ;;  %v797_v24 = vand.u32 4294901760, %v796_v17  ;;  %s988_s29 = sshll.u32 %s984_s20, 4  ;;  %s989_s29 = int_to_ptr.hbm [resolvable:$true] %s988_s29 }
 0x2d8   : > { %s1125_s12 = sshra.s32 %s989_s29, 4  ;;  %s1126_s12 = int_to_ptr.hbm [resolvable:$true] %s1125_s12 }
 0x2d9   : > { %v798_v31 = vsub.f32 %v796_v17, %v797_v24  ;;  %v829_v32 = vand.u32 4294901760, %v828_v23  ;;  %s1127_s25 = scalar_lea.hbm %s1126_s12, 8  ;;  %p1132_p0 = scmp.lt.s32.totalorder %s1126_s12, %s1397_s6 }
 0x2da   : > { %p1128_p11 = scmp.ne.s32.totalorder %s1126_s12, %s1127_s25  ;;  %p1133_p1 = scmp.lt.s32.totalorder %s1131_s18, %s1127_s25 }
 0x2db   : > { %v799_v39 = vand.u32 4294901760, %v798_v31  ;;  %v830_v40 = vsub.f32 %v828_v23, %v829_v32 }
 0x2dc   : > { %p1129_p12 = pnand %p1128_p11, %p1253_p5  ;;  %p1134_p2 = por %p1133_p1, %p1132_p0 }
 0x2dd   : > { %768 = vperm.xlu1 %1107, %v1057_v12   ;;  %v831_v45 = vand.u32 4294901760, %v830_v40 }
 0x2de   : > { %754 = vrot.lane.b32.xlu0 %v753_v11, %s1177_s16  ;;  %s1049_s16 = sshll.u32 %s238_s15, 3  ;;  %p1130_p13 = pneg %p1129_p12 }
 0x2df   : > { %s240_s26 = scalar_lea.vmem [#allocation2], %s1049_s16 }
 0x2e0   : > { %s986_s28 = sshll.u32 %s240_s26, 4  ;;  %p1135_p3 = pnand %p1134_p2, %p1130_p13  ;;  %s987_s28 = int_to_ptr.vmem [resolvable:$true] %s986_s28 }
 0x32f   : > { %v757_v15 = vpop.permute.xlu2 %756 }
 0x330   : > { %v791_v18 = vand.u32 4294901760, %v757_v15 }
 0x332   : > { %v834_v26 = vsub.f32 %v757_v15, %v791_v18 }
 0x334   : > { %v835_v33 = vand.u32 4294901760, %v834_v26 }
 0x336   : > { %v836_v43 = vsub.f32 %v834_v26, %v835_v33 }
 0x338   : > { %v837_v46 = vand.u32 4294901760, %v836_v43 }
 0x347   : > { %v759_v19 = vpop.permute.xlu1 %758 }
 0x348   : > { %v787_v20 = vand.u32 4294901760, %v759_v19  ;;  %v761_v21 = vpop.permute.xlu0 %760 }
 0x349   : > { %v785_v22 = vand.u32 4294901760, %v761_v21 }
 0x34a   : > { %v822_v25 = vsub.f32 %v759_v19, %v787_v20 }
 0x34b   : > { %v816_v27 = vsub.f32 %v761_v21, %v785_v22  ;;  %786 = vmatpush.msrb.mxu0 %v785_v22  ;;  %894 = vmatpush.msrb.mxu3 %v785_v22 }
 0x34c   : > { %v823_v28 = vand.u32 4294901760, %v822_v25 }
 0x34d   : > { %v817_v29 = vand.u32 4294901760, %v816_v27  ;;  %788 = vmatpush.msrb.mxu0 %v787_v20  ;;  %863 = vmatpush.msrb.mxu2 %v816_v27 }
 0x34e   : > { %896 = vmatpush.msrb.mxu3 %v787_v20  ;;  %v824_v35 = vsub.f32 %v822_v25, %v823_v28 }
 0x34f   : > { %v818_v34 = vsub.f32 %v816_v27, %v817_v29  ;;  %790 = vmatpush.msrb.mxu0 %v1349_v16  ;;  %866 = vmatpush.msrb.mxu2 %v822_v25  ;;  %v769_v50 = vpop.permute.xlu1 %768 }
 0x350   : > { %898 = vmatpush.msrb.mxu3 %v1349_v16  ;;  %v755_v36 = vpop.permute.xlu0 %754  ;;  %v825_v42 = vand.u32 4294901760, %v824_v35 }
 0x351   : > { %v819_v37 = vand.u32 4294901760, %v818_v34  ;;  %v793_v38 = vand.u32 4294901760, %v755_v36  ;;  %792 = vmatpush.msrb.mxu0 %v791_v18  ;;  %869 = vmatpush.msrb.mxu2 %v828_v23 }
 0x352   : > { %900 = vmatpush.msrb.mxu3 %v791_v18 }
 0x353   : > { %v840_v41 = vsub.f32 %v755_v36, %v793_v38  ;;  %794 = vmatpush.msrb.mxu0 %v793_v38  ;;  %820 = vmatpush.msrb.mxu1 %v819_v37 }
 0x354   : > { %872 = vmatpush.msrb.mxu2 %v834_v26  ;;  %902 = vmatpush.msrb.mxu3 %v793_v38 }
 0x355   : > { %v841_v44 = vand.u32 4294901760, %v840_v41  ;;  %800 = vmatmul.f32.vlgmr.msrb.gmra.mxu0 %v799_v39  ;;  %826 = vmatpush.msrb.mxu1 %v825_v42 }
 0x356   : > { %924 = vmatpush.msra.mxu0 %v817_v29  ;;  %875 = vmatpush.msrb.mxu2 %v840_v41 }
 0x357   : > { %832 = vmatpush.msrb.mxu1 %v831_v45  ;;  %878 = vmatmul.f32.vlgmr.msrb.gmra.mxu2 %v796_v17  ;;  %v842_v47 = vsub.f32 %v840_v41, %v841_v44 }
 0x358   : > { %928 = vmatpush.msra.mxu0 %v823_v28  ;;  %906 = vmatmul.f32.vlgmr.msrb.gmra.mxu3 %v797_v24 }
 0x359   : > { %838 = vmatpush.msrb.mxu1 %v837_v46  ;;  %v843_v48 = vand.u32 4294901760, %v842_v47 }
 0x35a   : > { %932 = vmatpush.msra.mxu0 %v829_v32 }
 0x35b   : > { %844 = vmatpush.msrb.mxu1 %v843_v48 }
 0x35c   : > { %936 = vmatpush.msra.mxu0 %v835_v33  ;;  %846 = vmatmul.f32.vlgmr.msrb.gmra.mxu1 %v1347_v30 }
 0x35d   : > { %958 = vmatpush.msra.mxu1 %v785_v22 }
 0x35e   : > { %940 = vmatpush.msra.mxu0 %v841_v44 }
 0x35f   : > { %960 = vmatpush.msra.mxu1 %v787_v20  ;;  %942 = vmatmul.f32.vlgmr.msra.gmra.mxu0 %v1347_v30 }
 0x361   : > { %962 = vmatpush.msra.mxu1 %v1349_v16 }
 0x363   : > { %964 = vmatpush.msra.mxu1 %v791_v18 }
 0x365   : > { %966 = vmatpush.msra.mxu1 %v793_v38 }
 0x366   : > { %968 = vmatmul.f32.vlgmr.msra.gmra.mxu1 %v1347_v30 }
 0x3d2   : > { %v801_v49 = vpop.f32.mrf.mxu0 }
 0x3d3   : > { %v802_v51 = vadd.f32 %v801_v49, %v769_v50 }
 0x3d9   : > { %v847_v52 = vpop.f32.mrf.mxu1 }
 0x3da   : > { %v848_v53 = vadd.f32 %v847_v52, %v802_v51  ;;  %v879_v54 = vpop.f32.mrf.mxu2 }
 0x3db   : > { %v907_v55 = vpop.f32.mrf.mxu3 }
 0x3dc   : > { %v880_v56 = vadd.f32 %v879_v54, %v848_v53  ;;  %v943_v57 = vpop.f32.mrf.mxu0 }
 0x3de   : > { %v908_v58 = vadd.f32 %v907_v55, %v880_v56 }
 0x3e0   : > { %v944_v59 = vadd.f32 %v943_v57, %v908_v58 }
 0x3e3   : > { %v969_v60 = vpop.f32.mrf.mxu1 }
 0x3e4   : > { %v970_v61 = vadd.f32 %v969_v60, %v944_v59 }
 0x3e6   : > { %972 = vst [vmem:[%s240_s26] sm:$0xff] %v970_v61 }
 0x3e7   : > { %1138 = shalt.err (!%p1135_p3)
}
 0x3e8   : > { %1062 = dma.vmem_to_hbm [thread:$0]  (%p1253_p5), %s987_s28, 128, %s989_s29, %s974_s9  }
 0x3e9 PF: > { %p1068_p4 = scmp.ge.s32.totalorder %s1173_s24, 2  ;;  %s1000_s15 = sand.u32 1, %s1161_s21  }
 0x3ea   : > { %s1001_s10 = scalar_lea.sflag [#allocation3], %s1000_s15 }
 0x3eb   : > { %p1065_p7 = pnand %p1068_p4, %p1257_p6 }
 0x3ed   : > { %p1066_p8 = pneg %p1065_p7 }
 0x3ef   : > { %1156 = dma.done.wait (%p1066_p8), %s1001_s10, 128  }
 0x3f0   : > { %1158 = vsyncadd (%p1066_p8), %s1001_s10, 4294967168  ;;  %p16_p9 = scmp.ge.s32.totalorder %s1240_s27, 4   ;;  %s1400_s21 = smov %s1165_s22 }
 0x3f1   : > { %s1401_s22 = smov %s1169_s23  ;;  %s1402_s23 = smov %s1251_s30 }
 0x3f2   : > { %s1403_s24 = smov %s1240_s27  ;;  %18 = sbr.rel (!%p16_p9) target bundleno = 3 (0x3), region = 87 }
 0x3f7   :  { %1007 = vsyncpa [#allocation3], 1 }
 0x3f8   :  { %1009 = vsyncpa [#allocation3 + $0x1], 1 }

</bundles_post_ra>
